<compile_context>
chip_gen: v5e
topology: v5e:2x2
jax: 0.10.0
libtpu: 0.0.40
codegen_flags: <defaults>
</compile_context>

<pallas_src>
import functools

import jax
import jax.numpy as jnp
from jax.experimental import pallas as pl
from jax.experimental.pallas import tpu as pltpu


def _round_up(n, m):
    return ((n + m - 1) // m) * m


def _wrapped_model_kernel(
    aT_ref,    # (DQ+DI, TM) bf16  fused [query; inputs] tile, channels-major
    w1T_ref,   # (H, DQ+DI)  bf16  merged first-layer weight (query-normalizer folded in)
    b1T_ref,   # (H, 1)      f32   first-layer bias, with -(q_mu/(q_sigma+eps))@w1x folded in
    w2T_ref,   # (DO, H)     bf16  second-layer weight, pre-scaled by (o_sigma+eps)
    b2T_ref,   # (DO, 1)     f32   second-layer bias, with o_mu folded in
    outT_ref,  # (DO, TM)    f32   output tile, channels-major (lane-dense stores)
):
    # h^T = W1^T a^T + b1^T   (tokens on the lane axis; bf16 operands, f32 accumulate)
    h = (
        jnp.dot(w1T_ref[...], aT_ref[...], preferred_element_type=jnp.float32)
        + b1T_ref[...]
    )
    h = jax.nn.gelu(h)  # f32 VPU/EUP work, lane-dense
    outT_ref[...] = (
        jnp.dot(w2T_ref[...], h.astype(jnp.bfloat16),
                preferred_element_type=jnp.float32)
        + b2T_ref[...]
    ).astype(outT_ref.dtype)


@functools.partial(jax.jit, static_argnames=("tm", "eps"))
def wrapped_model_forward(x, inputs, params, tm=8192, eps=1e-5):
    """x: [B, N, DQ], inputs: [B, N, DI] -> [B, N, DO] (float32)."""
    B, N, DQ = x.shape
    DI = inputs.shape[-1]
    H = params["w1x"].shape[-1]
    DO = params["w2"].shape[-1]
    DC = DQ + DI
    M = B * N
    f32, bf16 = jnp.float32, jnp.bfloat16

    # ---- fold normalizers (with +eps) into the MLP weights, exact algebra in f32 ----
    q_scale = 1.0 / (params["q_sigma"].astype(f32) + eps)                 # (1, DQ)
    w1x_f = params["w1x"].astype(f32) * q_scale.T                         # (DQ, H)
    b1_f = params["b1"].astype(f32) - (
        (params["q_mu"].astype(f32) * q_scale) @ params["w1x"].astype(f32)
    )                                                                     # (1, H)
    o_scale = params["o_sigma"].astype(f32) + eps                         # (1, DO)
    w2_f = params["w2"].astype(f32) * o_scale                             # (H, DO)
    b2_f = params["b2"].astype(f32) * o_scale + params["o_mu"].astype(f32)

    # merged, channels-major, bf16 weights (tiny; stay VMEM-resident across the grid)
    w1_f = jnp.concatenate([w1x_f, params["w1i"].astype(f32)], axis=0)    # (DQ+DI, H)
    w1T = w1_f.T.astype(bf16)                                             # (H, DC)
    b1T = b1_f.T                                                          # (H, 1) f32
    w2T = w2_f.T.astype(bf16)                                             # (DO, H)
    b2T = b2_f.T                                                          # (DO, 1) f32

    # ---- row tile: large (amortize grid-step overhead) but keep >=~8 steps for v7x ----
    tm_eff = max(128, _round_up(min(tm, -(-M // 8)), 128))
    M_pad = _round_up(M, tm_eff)

    # ---- single fused concat-transpose of the activations into (DC, M_pad) bf16 ----
    # (Layout plumbing forced by the PyTorch [B, N, C] convention; a channels-major
    #  producer would emit this directly. Pad fuses into the same transpose pass.)
    a = jnp.concatenate(
        [x.reshape(M, DQ), inputs.reshape(M, DI)], axis=-1
    ).astype(bf16)                                                        # (M, DC)
    aT = a.T                                                              # (DC, M)
    if M_pad != M:
        aT = jnp.pad(aT, ((0, 0), (0, M_pad - M)))

    tok_spec = lambda c: pl.BlockSpec((c, tm_eff), lambda i: (0, i))
    full_spec = lambda r, c: pl.BlockSpec((r, c), lambda i: (0, 0))

    outT = pl.pallas_call(
        _wrapped_model_kernel,
        out_shape=jax.ShapeDtypeStruct((DO, M_pad), f32),
        grid_spec=pltpu.PrefetchScalarGridSpec(
            num_scalar_prefetch=0,
            grid=(M_pad // tm_eff,),
            in_specs=[
                tok_spec(DC),        # aT  (fused query|inputs stream)
                full_spec(H, DC),    # w1T
                full_spec(H, 1),     # b1T
                full_spec(DO, H),    # w2T
                full_spec(DO, 1),    # b2T
            ],
            out_specs=tok_spec(DO),
        ),
        compiler_params=pltpu.CompilerParams(
            dimension_semantics=("parallel",),
        ),
    )(aT, w1T, b1T, w2T, b2T)

    return outT[:, :M].T.reshape(B, N, DO)


def _reference_forward(x, inputs, params, eps=1e-5):
    """Pure-JAX f32 reference: explicit normalize -> MLP -> denormalize (no folding)."""
    xq = (x - params["q_mu"][None]) / (params["q_sigma"][None] + eps)
    h = xq @ params["w1x"] + inputs @ params["w1i"] + params["b1"]
    h = jax.nn.gelu(h)
    y = h @ params["w2"] + params["b2"]
    return y * (params["o_sigma"][None] + eps) + params["o_mu"][None]


if __name__ == "__main__":
    # Small shapes consistent with a query/inputs neural-operator forward.
    B, N = 2, 128          # batch, number of query points
    DQ, DI = 8, 8          # query-coord channels, input-function channels
    H, DO = 32, 8          # hidden width, output channels
    EPS = 1e-5

    key = jax.random.PRNGKey(0)
    ks = jax.random.split(key, 10)

    x = jax.random.normal(ks[0], (B, N, DQ), jnp.float32)
    inputs = jax.random.normal(ks[1], (B, N, DI), jnp.float32)

    params = {
        # normalizer statistics (deterministic synthetic "fitted" stats)
        "q_mu": 0.1 * jax.random.normal(ks[2], (1, DQ), jnp.float32),
        "q_sigma": jnp.abs(jax.random.normal(ks[3], (1, DQ), jnp.float32)) + 0.5,
        "o_mu": 0.1 * jax.random.normal(ks[4], (1, DO), jnp.float32),
        "o_sigma": jnp.abs(jax.random.normal(ks[5], (1, DO), jnp.float32)) + 0.5,
        # inner model weights
        "w1x": 0.1 * jax.random.normal(ks[6], (DQ, H), jnp.float32),
        "w1i": 0.1 * jax.random.normal(ks[7], (DI, H), jnp.float32),
        "b1": jnp.zeros((1, H), jnp.float32),
        "w2": 0.1 * jax.random.normal(ks[8], (H, DO), jnp.float32),
        "b2": jnp.zeros((1, DO), jnp.float32),
    }

    out = wrapped_model_forward(x, inputs, params, eps=EPS)
    out = jax.block_until_ready(out)

    ref = _reference_forward(x, inputs, params, eps=EPS)
    assert out.shape == (B, N, DO)
    # bf16 activation/weight streaming (f32 accumulation) => loosened tolerance vs f32 ref.
    assert jnp.allclose(out, ref, atol=2e-2, rtol=2e-2)

    print("KERNEL_OK")
</pallas_src>

<mosaic_0001>
module attributes {stable_mosaic.version = 11 : i64} {
  func.func @_wrapped_model_kernel(%arg0: i32, %arg1: memref<16x128xbf16, #tpu.memory_space<vmem>>, %arg2: memref<32x16xbf16, #tpu.memory_space<vmem>>, %arg3: memref<32x1xf32, #tpu.memory_space<vmem>>, %arg4: memref<8x32xbf16, #tpu.memory_space<vmem>>, %arg5: memref<8x1xf32, #tpu.memory_space<vmem>>, %arg6: memref<8x128xf32, #tpu.memory_space<vmem>>) attributes {dimension_semantics = [#tpu.dimension_semantics<parallel>], iteration_bounds = array<i64: 2>, scalar_prefetch = 0 : i64, scratch_operands = 0 : i64, tpu.core_type = #tpu.core_type<tc>, window_params = [{transform_indices = @transform_0, window_bounds = array<i64: 16, 128>}, {pipeline_mode = #tpu.pipeline_mode<synchronous>, transform_indices = @transform_1, window_bounds = array<i64: 32, 16>}, {pipeline_mode = #tpu.pipeline_mode<synchronous>, transform_indices = @transform_2, window_bounds = array<i64: 32, 1>}, {pipeline_mode = #tpu.pipeline_mode<synchronous>, transform_indices = @transform_3, window_bounds = array<i64: 8, 32>}, {pipeline_mode = #tpu.pipeline_mode<synchronous>, transform_indices = @transform_4, window_bounds = array<i64: 8, 1>}, {transform_indices = @transform_5, window_bounds = array<i64: 8, 128>}]} {
    %c0 = arith.constant 0 : index
    %c0_0 = arith.constant 0 : index
    %0 = vector.load %arg2[%c0, %c0_0] : memref<32x16xbf16, #tpu.memory_space<vmem>>, vector<32x16xbf16>
    %c0_1 = arith.constant 0 : index
    %c0_2 = arith.constant 0 : index
    %1 = vector.load %arg1[%c0_1, %c0_2] : memref<16x128xbf16, #tpu.memory_space<vmem>>, vector<16x128xbf16>
    %cst = arith.constant dense<0.000000e+00> : vector<32x128xf32>
    %2 = tpu.matmul %0, %1, %cst {dimension_numbers = #tpu.dot_dimension_numbers<[1], [0], [0], [1], [0, 0, 1, 1], [], []>} : vector<32x16xbf16>, vector<16x128xbf16>, vector<32x128xf32> -> vector<32x128xf32>
    %c0_3 = arith.constant 0 : index
    %c0_4 = arith.constant 0 : index
    %3 = vector.load %arg3[%c0_3, %c0_4] : memref<32x1xf32, #tpu.memory_space<vmem>>, vector<32x1xf32>
    %4 = vector.broadcast %3 : vector<32x1xf32> to vector<32x128xf32>
    %5 = arith.addf %2, %4 : vector<32x128xf32>
    %6 = arith.mulf %5, %5 : vector<32x128xf32>
    %7 = arith.mulf %5, %6 : vector<32x128xf32>
    %cst_5 = arith.constant 4.471500e-02 : f32
    %8 = vector.broadcast %cst_5 : f32 to vector<32x128xf32>
    %9 = arith.mulf %8, %7 : vector<32x128xf32>
    %10 = arith.addf %5, %9 : vector<32x128xf32>
    %cst_6 = arith.constant 0.797884583 : f32
    %11 = vector.broadcast %cst_6 : f32 to vector<32x128xf32>
    %12 = arith.mulf %11, %10 : vector<32x128xf32>
    %13 = math.tanh %12 : vector<32x128xf32>
    %cst_7 = arith.constant 1.000000e+00 : f32
    %14 = vector.broadcast %cst_7 : f32 to vector<32x128xf32>
    %15 = arith.addf %14, %13 : vector<32x128xf32>
    %cst_8 = arith.constant 5.000000e-01 : f32
    %16 = vector.broadcast %cst_8 : f32 to vector<32x128xf32>
    %17 = arith.mulf %16, %15 : vector<32x128xf32>
    %18 = arith.mulf %5, %17 : vector<32x128xf32>
    %c0_9 = arith.constant 0 : index
    %c0_10 = arith.constant 0 : index
    %19 = vector.load %arg4[%c0_9, %c0_10] : memref<8x32xbf16, #tpu.memory_space<vmem>>, vector<8x32xbf16>
    %20 = arith.truncf %18 : vector<32x128xf32> to vector<32x128xbf16>
    %cst_11 = arith.constant dense<0.000000e+00> : vector<8x128xf32>
    %21 = tpu.matmul %19, %20, %cst_11 {dimension_numbers = #tpu.dot_dimension_numbers<[1], [0], [0], [1], [0, 0, 1, 1], [], []>} : vector<8x32xbf16>, vector<32x128xbf16>, vector<8x128xf32> -> vector<8x128xf32>
    %c0_12 = arith.constant 0 : index
    %c0_13 = arith.constant 0 : index
    %22 = vector.load %arg5[%c0_12, %c0_13] : memref<8x1xf32, #tpu.memory_space<vmem>>, vector<8x1xf32>
    %23 = vector.broadcast %22 : vector<8x1xf32> to vector<8x128xf32>
    %24 = arith.addf %21, %23 : vector<8x128xf32>
    %c0_14 = arith.constant 0 : index
    %c0_15 = arith.constant 0 : index
    %25 = vector.load %arg6[%c0_14, %c0_15] : memref<8x128xf32, #tpu.memory_space<vmem>>, vector<8x128xf32>
    tpu.vector_store %arg6[%c0_14, %c0_15], %24 {strides = array<i32>} : memref<8x128xf32, #tpu.memory_space<vmem>>, vector<8x128xf32>,
    return
  }
  func.func @transform_0(%arg0: i32) -> (i32, i32) {
    %c0_i32 = arith.constant 0 : i32
    %c0_i32_0 = arith.constant 0 : i32
    return %c0_i32, %arg0 : i32, i32
  }
  func.func @transform_1(%arg0: i32) -> (i32, i32) {
    %c0_i32 = arith.constant 0 : i32
    %c0_i32_0 = arith.constant 0 : i32
    %c0_i32_1 = arith.constant 0 : i32
    return %c0_i32, %c0_i32_0 : i32, i32
  }
  func.func @transform_2(%arg0: i32) -> (i32, i32) {
    %c0_i32 = arith.constant 0 : i32
    %c0_i32_0 = arith.constant 0 : i32
    %c0_i32_1 = arith.constant 0 : i32
    return %c0_i32, %c0_i32_0 : i32, i32
  }
  func.func @transform_3(%arg0: i32) -> (i32, i32) {
    %c0_i32 = arith.constant 0 : i32
    %c0_i32_0 = arith.constant 0 : i32
    %c0_i32_1 = arith.constant 0 : i32
    return %c0_i32, %c0_i32_0 : i32, i32
  }
  func.func @transform_4(%arg0: i32) -> (i32, i32) {
    %c0_i32 = arith.constant 0 : i32
    %c0_i32_0 = arith.constant 0 : i32
    %c0_i32_1 = arith.constant 0 : i32
    return %c0_i32, %c0_i32_0 : i32, i32
  }
  func.func @transform_5(%arg0: i32) -> (i32, i32) {
    %c0_i32 = arith.constant 0 : i32
    %c0_i32_0 = arith.constant 0 : i32
    return %c0_i32, %arg0 : i32, i32
  }
}

</mosaic_0001>

<bundles_post_ra>
// kernel: wrapped_model_forward.1
= control target key start
LH: loop header
LB: loop body
LE: loop exit
PB: predicated region body
PF: predicated region fallthrough
CT: control target
= control target key end

     0   :  { %10 = vsyncpa [#allocation4], 0  ;;  %s786_s0 = inlined_call_operand.vmem [shape: bf16[16,256], index: 0, kind: input, shape index: {}]   ;;  %s787_s1 = inlined_call_operand.vmem [shape: bf16[32,16], index: 1, kind: input, shape index: {}]   ;;  %s788_s2 = inlined_call_operand.vmem [shape: f32[32,1], index: 2, kind: input, shape index: {}]   ;;  %s789_s3 = inlined_call_operand.vmem [shape: bf16[8,32], index: 3, kind: input, shape index: {}]   ;;  %s790_s4 = inlined_call_operand.vmem [shape: f32[8,1], index: 4, kind: input, shape index: {}]   ;;  %s791_s5 = inlined_call_operand.hbm [shape: f32[8,256], index: 5, kind: output, shape index: {}]  }
   0x1   :  { %12 = vsyncpa [#allocation4 + $0x1], 0  ;;  %s664_s18 = smov 0   ;;  %s666_s19 = smov 0  }
   0x2   :  { %s668_s20 = smov 0   ;;  %s670_s21 = smov 0  }
   0x3 LB: > { %s486_s22 = sadd.s32 4294967295, %s631_s21   ;;  %s487_s23 = sadd.s32 4294967294, %s631_s21   ;;  %s631_s21 = sphi %s670_s21, %s797_s21   ;;  %s627_s20 = sphi %s668_s20, %s796_s20   ;;  %s623_s19 = sphi %s666_s19, %s795_s19   ;;  %s619_s18 = sphi %s664_s18, %s794_s18  }
   0x4   : > { %s687_s24 = sadd.s32 1, %s631_s21   ;;  %s25_s25 = sadd.s32 1, %s627_s20 }
   0x5   : > { %s22_s26 = ssub.s32 %s631_s21, %s687_s24  ;;  %p32_p0 = scmp.ne.s32.totalorder %s627_s20, %s623_s19 }
   0x6   : > { %p23_p1 = scmp.eq.s32.totalorder %s22_s26, 0  ;;  %p33_p2 = scmp.eq.s32.totalorder %s631_s21, 0 }
   0x7   : > { %p146_p3 = scmp.eq.s32.totalorder %s486_s22, 1  ;;  %p151_p4 = scmp.ne.s32.totalorder %s623_s19, %s619_s18 }
   0x8   : > { %s700_s27 = scalar_select %p23_p1, %s627_s20, %s25_s25  }
   0x9   : > { %p34_p5 = por %p33_p2, %p32_p0  ;;  %p702_p6 = por %p146_p3, %p32_p0 }
   0xa   : > { %p152_p7 = scmp.eq.s32.totalorder %s487_s23, 1  ;;  %p489_p9 = scmp.ge.s32.totalorder %s631_s21, 2 }
   0xc   : > { %p706_p8 = por %p152_p7, %p151_p4  ;;  %180 = sbr.rel (%p489_p9) target bundleno = 23 (0x17), region = 32 }
  0x11   : > { %183 = sbr.rel (!%p34_p5) target bundleno = 23 (0x17), region = 36  ;;  %s185_s30 = sand.u32 (%p34_p5), 1, %s627_s20  }
  0x12   : > { %s491_s6 = sshll.u32 (%p34_p5), %s631_s21, 2  ;;  %s490_s7 = sshll.u32 (%p34_p5), %s185_s30, 3 }
  0x13   : > { %s189_s10 = scalar_lea.vmem (%p34_p5), %s786_s0, %s491_s6  ;;  %s187_s11 = scalar_lea.vmem (%p34_p5), [#allocation2], %s490_s7 }
  0x14   : > { %v206_v0 = vld [vmem:[%s189_s10] sm:$0xf] (%p34_p5)  ;;  %v208_v1 = vld [vmem:[%s189_s10 + $0x8] sm:$0xf] (%p34_p5) }
  0x15   : > { %207 = vst [vmem:[%s187_s11] sm:$0xf] (%p34_p5), %v206_v0 }
  0x16   : > { %209 = vst [vmem:[%s187_s11 + $0x4] sm:$0xf] %v208_v1 }
  0x17 PF: > { %p492_p10 = scmp.ge.s32.totalorder %s631_s21, 1  ;;  %p236_p11 = scmp.lt.s32.totalorder %s631_s21, 3 }
  0x19   : > { %p237_p12 = pnand %p492_p10, %p236_p11 }
  0x1a   : > { %s243_s12 = sand.u32 (!%p237_p12), 1, %s623_s19   ;;  %s511_s17 = sshll.u32 (!%p237_p12), %s486_s22, 3 }
  0x1b   : > { %240 = sbr.rel (%p237_p12) target bundleno = 347 (0x15b), region = 77  ;;  %s726_s15 = sshll.u32 (!%p237_p12), %s243_s12, 3 }
  0x1c   : > { %s245_s23 = scalar_lea.vmem (!%p237_p12), [#allocation2], %s726_s15  ;;  %s417_s26 = scalar_lea.hbm (!%p237_p12), %s791_s5, %s511_s17 }
  0x1d   : > { %s269_s30 = scalar_lea.vmem (!%p237_p12), [#allocation3], %s726_s15  ;;  %s421_s7 = sshll.u32 (!%p237_p12), %s417_s26, 4  ;;  %s422_s7 = int_to_ptr.hbm [resolvable:$true] %s421_s7 }
  0x1e   : > { %s419_s6 = sshll.u32 (!%p237_p12), %s269_s30, 4  ;;  %s407_s8 = scalar_lea.sflag (!%p237_p12), [#allocation4], %s243_s12  ;;  %s420_s6 = int_to_ptr.vmem [resolvable:$true] %s419_s6 }
  0x1f   : > { %s583_s9 = sshra.s32 (!%p237_p12), %s422_s7, 4  ;;  %s589_s15 = scalar_lea.hbm (!%p237_p12), %s791_s5, 16  ;;  %s584_s9 = int_to_ptr.hbm [resolvable:$true] %s583_s9 }
  0x20   : > { %v279_v2 = vld [vmem:[%s788_s2 + $0x10] sm:$0xff]  ;;  %v633_v3 = vmov 0   ;;  %v277_v4 = vld [vmem:[%s788_s2] sm:$0xff]  ;;  %v515_v7 = vld [vmem:[%s787_s1 + $0x8] sm:$0xff]  ;;  %vm317_vm0 = vcmask 130048   ;;  %vm388_vm1 = vcmask 261120   ;;  %p590_p2 = scmp.lt.s32.totalorder %s584_s9, %s791_s5 }
  0x21   : > { %558 = vset.pattern.permute.xlu0 %v633_v3  ;;  %559 = vset.pattern.permute.xlu1 %v633_v3  ;;  %v516_v5 = vld [vmem:[%s245_s23] sm:$0xff]  ;;  %v280_v8 = vld [vmem:[%s788_s2 + $0x18] sm:$0xff]  ;;  %s585_s10 = scalar_lea.hbm %s584_s9, 8 }
  0x22   : > { %293 = vperm.xlu0 %558, %v279_v2   ;;  %283 = vperm.xlu1 %559, %v277_v4   ;;  %v514_v6 = vld [vmem:[%s787_s1] sm:$0xff]  ;;  %v278_v9 = vld [vmem:[%s788_s2 + $0x8] sm:$0xff]  ;;  %p586_p13 = scmp.ne.s32.totalorder %s584_s9, %s585_s10  ;;  %p591_p3 = scmp.lt.s32.totalorder %s589_s15, %s585_s10 }
  0x23   : > { %560 = vset.pattern.permute.xlu2 %v633_v3  ;;  %331 = vmatpush.bf16.msra.mxu0 %v516_v5  ;;  %v382_v36 = vld [vmem:[%s790_s4] sm:$0xff] }
  0x24   : > { %517 = vmatpush.bf16.msra.mxu2 %v516_v5  ;;  %385 = vperm.xlu2 %560, %v382_v36   ;;  %v379_v61 = vld [vmem:[%s789_s3] sm:$0xf]  ;;  %p587_p0 = pnand %p586_p13, %p702_p6  ;;  %p592_p4 = por %p591_p3, %p590_p2 }
  0x26   : > { %507 = vmatmul.msk.bf16.vlgmr.msra.gmra.mxu0 %vm317_vm0, %v514_v6  ;;  %p588_p1 = pneg %p587_p0 }
  0x27   : > { %508 = vmatmul.msk.bf16.vlgmr.msra.gmra.mxu2 %vm317_vm0, %v515_v7 }
  0x28   : > { %p593_p5 = pnand %p592_p4, %p588_p1 }
  0x2a   : > { %298 = vperm.xlu0 %558, %v280_v8   ;;  %288 = vperm.xlu1 %559, %v278_v9  }
  0x7e   : > { %v386_v62 = vpop.permute.xlu2 %385 }
  0x94   : > { %v284_v10 = vpop.permute.xlu1 %283  ;;  %v294_v13 = vpop.permute.xlu0 %293 }
  0x9c   : > { %v289_v16 = vpop.permute.xlu1 %288  ;;  %v299_v27 = vpop.permute.xlu0 %298 }
  0xa3   : > { %v333_v11 = vpop.f32.mrf.mxu0 }
  0xa4   : > { %v334_v12 = vadd.f32 %v333_v11, %v284_v10 }
  0xa6   : > { %v343_v14 = vmul.f32 %v334_v12, %v334_v12 }
  0xa8   : > { %v347_v19 = vmul.f32 %v343_v14, %v334_v12 }
  0xaa   : > { %v338_v15 = vpop.f32.mrf.mxu2  ;;  %v351_v24 = vmul.f32 0.044715, %v347_v19 }
  0xab   : > { %v339_v17 = vadd.f32 %v338_v15, %v294_v13  ;;  %v335_v18 = vpop.f32.mrf.mxu0 }
  0xac   : > { %v336_v21 = vadd.f32 %v335_v18, %v289_v16  ;;  %v355_v32 = vadd.f32 %v351_v24, %v334_v12 }
  0xad   : > { %v345_v20 = vmul.f32 %v339_v17, %v339_v17 }
  0xae   : > { %v344_v23 = vmul.f32 %v336_v21, %v336_v21  ;;  %v359_v40 = vmul.f32 0.7978846, %v355_v32 }
  0xaf   : > { %v349_v22 = vmul.f32 %v345_v20, %v339_v17 }
  0xb0   : > { %v348_v26 = vmul.f32 %v344_v23, %v336_v21 }
  0xb1   : > { %v353_v25 = vmul.f32 0.044715, %v349_v22 }
  0xb2   : > { %v340_v28 = vpop.f32.mrf.mxu2  ;;  %v352_v29 = vmul.f32 0.044715, %v348_v26 }
  0xb3   : > { %v341_v30 = vadd.f32 %v340_v28, %v299_v27  ;;  %v357_v31 = vadd.f32 %v353_v25, %v339_v17 }
  0xb4   : > { %v356_v33 = vadd.f32 %v352_v29, %v336_v21 }
  0xb5   : > { %v346_v34 = vmul.f32 %v341_v30, %v341_v30  ;;  %v361_v35 = vmul.f32 0.7978846, %v357_v31 }
  0xb6   : > { %v360_v38 = vmul.f32 0.7978846, %v356_v33 }
  0xb7   : > { %v350_v37 = vmul.f32 %v346_v34, %v341_v30  ;;  %561 = vtanh.f32 %v361_v35 }
  0xb8   : > { %563 = vtanh.f32 %v360_v38 }
  0xb9   : > { %v354_v39 = vmul.f32 0.044715, %v350_v37  ;;  %565 = vtanh.f32 %v359_v40 }
  0xbb   : > { %v358_v41 = vadd.f32 %v354_v39, %v341_v30 }
  0xbd   : > { %v362_v42 = vmul.f32 0.7978846, %v358_v41  ;;  %v562_v43 = vpop.eup %561 }
  0xbe   : > { %v564_v44 = vpop.eup %563  ;;  %v369_v45 = vadd.f32 1.0, %v562_v43 }
  0xbf   : > { %567 = vtanh.f32 %v362_v42  ;;  %v566_v46 = vpop.eup %565  ;;  %v368_v47 = vadd.f32 1.0, %v564_v44 }
  0xc0   : > { %v373_v50 = vmul.f32 0.5, %v369_v45  ;;  %v367_v51 = vadd.f32 1.0, %v566_v46 }
  0xc1   : > { %v372_v53 = vmul.f32 0.5, %v368_v47 }
  0xc2   : > { %v377_v54 = vmul.f32 %v373_v50, %v339_v17  ;;  %v371_v56 = vmul.f32 0.5, %v367_v51 }
  0xc3   : > { %v376_v58 = vmul.f32 %v372_v53, %v336_v21 }
  0xc4   : > { %v375_v59 = vmul.f32 %v371_v56, %v334_v12 }
  0xc5   : > { %v568_v48 = vpop.eup %567 }
  0xc6   : > { %v370_v49 = vadd.f32 1.0, %v568_v48  ;;  %v380_v60 = vpack.c.bf16 %v376_v58, %v375_v59 }
  0xc8   : > { %v374_v52 = vmul.f32 0.5, %v370_v49 }
  0xca   : > { %v378_v55 = vmul.f32 %v374_v52, %v341_v30 }
  0xcc   : > { %v381_v57 = vpack.c.bf16 %v378_v55, %v377_v54 }
  0xce   : > { %398 = vmatpush.bf16.msra.mxu1 %v381_v57 }
  0xd2   : > { %399 = vmatpush.bf16.msra.mxu1 %v380_v60 }
  0xd5   : > { %509 = vmatmul.msk.bf16.vlgmr.msra.gmra.mxu1 %vm388_vm1, %v379_v61 }
 0x152   : > { %v401_v63 = vpop.f32.mrf.mxu1 }
 0x153   : > { %v402_v0 = vadd.f32 %v401_v63, %v386_v62 }
 0x155   : > { %405 = vst [vmem:[%s269_s30] sm:$0xff] %v402_v0 }
 0x156   : > { %596 = shalt.err (!%p593_p5)
}
 0x157   : > { %518 = dma.vmem_to_hbm [thread:$0]  (%p702_p6), %s420_s6, 128, %s422_s7, %s407_s8  }
 0x15a   : > { %v403_v1 = vpop.f32.mrf.mxu1 }
 0x15b PF: > { %s433_s12 = sand.u32 1, %s619_s18   ;;  %p521_p7 = pnand %p489_p9, %p706_p8 }
 0x15c   : > { %s434_s16 = scalar_lea.sflag [#allocation4], %s433_s12 }
 0x15d   : > { %p522_p10 = pneg %p521_p7 }
 0x15f   : > { %614 = dma.done.wait (%p522_p10), %s434_s16, 128  }
 0x160   : > { %616 = vsyncadd (%p522_p10), %s434_s16, 4294967168  ;;  %p15_p11 = scmp.ge.s32.totalorder %s687_s24, 4   ;;  %s794_s18 = smov %s623_s19 }
 0x161   : > { %s795_s19 = smov %s627_s20  ;;  %s796_s20 = smov %s700_s27 }
 0x162   : > { %s797_s21 = smov %s687_s24  ;;  %17 = sbr.rel (!%p15_p11) target bundleno = 3 (0x3), region = 121 }
 0x167   :  { %440 = vsyncpa [#allocation4], 1 }
 0x168   :  { %442 = vsyncpa [#allocation4 + $0x1], 1 }

</bundles_post_ra>
